<compile_context>
chip_gen: v5e
topology: v5e:2x2
jax: 0.10.0
libtpu: 0.0.40
codegen_flags: <defaults>
</compile_context>

<pallas_src>
import numpy as np
import jax
import jax.numpy as jnp
from jax import lax
from jax.experimental import pallas as pl
from jax.experimental.pallas import tpu as pltpu


D_PAD = 128  # lane-dense width used for activations, weights and output


# ----------------------------- Pallas kernel ------------------------------

def _fused_net_kernel(x_ref, img_ref, w_ref, thr_ref, pack_ref, o_ref):
    """Run every block on one row-tile with activations resident in vregs.

    x_ref    : (tile_m, D_PAD)    bf16  {0,1} input bits (zero-padded lanes)
    img_ref  : (tile_m, D_PAD)    f32   target RGB ints in lanes 0..2, else 0
    w_ref    : (nb, D_PAD, D_PAD) bf16  per-block +/-1 weights (0 in padding)
    thr_ref  : (nb, 1, D_PAD)     f32   folded thresholds thr - sum(1-m)
                                        (+big in padded lanes -> emit 0)
    pack_ref : (D_PAD, D_PAD)     bf16  bit -> RGB-int packing matrix (cols 0..2)
    o_ref    : (tile_m, D_PAD)    f32   lanes 0..2: packed R,G,B ints,
                                        lane 3: per-row sum |rgb - target|
    """
    x = x_ref[...]                                    # bf16 {0,1}
    nb = w_ref.shape[0]
    for b in range(nb):                               # static unroll (nb tiny)
        # sums = #{i : x_i == m_ij} - bias, exact in f32 accumulation
        s = jnp.dot(x, w_ref[b], preferred_element_type=jnp.float32)
        x = (s > thr_ref[b]).astype(jnp.bfloat16)     # next block's {0,1} bits
    # bits (channel-major, LSB-first) -> RGB integers, lane-dense
    rgb = jnp.dot(x, pack_ref[...], preferred_element_type=jnp.float32)
    # fused error epilogue: padded lanes are 0 in both rgb and img -> no effect
    err = jnp.abs(rgb - img_ref[...])
    row_err = jnp.sum(err, axis=-1, keepdims=True)    # (tile_m, 1)
    lane = lax.broadcasted_iota(jnp.int32, rgb.shape, 1)
    o_ref[...] = jnp.where(lane < 3, rgb,
                           jnp.where(lane == 3, row_err, 0.0))


def fused_net_forward(x_bits, img_rgb, w_all, thr_all, pack, tile_m, cost):
    """x_bits: (N, D_PAD) bf16; img_rgb: (N, D_PAD) f32.
    Returns (N, D_PAD) f32 with RGB ints in lanes 0..2 and error sums in lane 3."""
    N = x_bits.shape[0]
    nb = w_all.shape[0]
    grid = (pl.cdiv(N, tile_m),)
    return pl.pallas_call(
        _fused_net_kernel,
        out_shape=jax.ShapeDtypeStruct((N, D_PAD), jnp.float32),
        grid_spec=pltpu.PrefetchScalarGridSpec(
            num_scalar_prefetch=0,
            grid=grid,
            in_specs=[
                pl.BlockSpec((tile_m, D_PAD), lambda i: (i, 0)),
                pl.BlockSpec((tile_m, D_PAD), lambda i: (i, 0)),
                pl.BlockSpec((nb, D_PAD, D_PAD), lambda i: (0, 0, 0)),
                pl.BlockSpec((nb, 1, D_PAD), lambda i: (0, 0, 0)),
                pl.BlockSpec((D_PAD, D_PAD), lambda i: (0, 0)),
            ],
            out_specs=pl.BlockSpec((tile_m, D_PAD), lambda i: (i, 0)),
        ),
        compiler_params=pltpu.CompilerParams(
            dimension_semantics=("parallel",)),
        cost_estimate=cost,
    )(x_bits, img_rgb, w_all, thr_all, pack)


# ------------------------------ JAX glue ----------------------------------

def get_binary_position_encoding(shape):
    """(h, w) -> (h, w, nbits_h + nbits_w) boolean binary coords (LSB first)."""
    encs = []
    for axis, size in enumerate(shape):
        nbits = max(1, int(np.ceil(np.log2(size))))
        coords = jnp.arange(size)
        bits = (coords[:, None] >> jnp.arange(nbits)[None, :]) & 1
        shp = [1] * len(shape) + [nbits]
        shp[axis] = size
        bits = jnp.broadcast_to(bits.reshape(shp), tuple(shape) + (nbits,))
        encs.append(bits)
    return jnp.concatenate(encs, axis=-1).astype(jnp.bool_)


def _num_parallel_tiles():
    """2 row-tiles on v7x (2 TensorCores/chip); 1 on single-TC v5e/v6e."""
    try:
        kind = jax.devices()[0].device_kind.lower()
    except Exception:
        return 1
    return 2 if "v7" in kind else 1


class PallasModel:
    def __init__(self, image, hidden_dim, num_blocks, key):
        c, h, w = image.shape
        pos_enc = get_binary_position_encoding((h, w))        # (h, w, P) bool
        P = pos_enc.shape[-1]
        self.hw = (h, w)

        block_sizes = [P] + [hidden_dim] * (num_blocks - 1) + [24]
        assert max(block_sizes) <= D_PAD, "dims must fit in one 128-lane tile"

        # raw params — same distributions as the PyTorch reference
        self.blocks = []
        for dim_in, dim_out in zip(block_sizes[:-1], block_sizes[1:]):
            key, k_thr, k_msk = jax.random.split(key, 3)
            thresholds = jax.random.randint(k_thr, (dim_out,), 0, dim_in,
                                            dtype=jnp.int32)
            masks = jax.random.uniform(k_msk, (dim_in, dim_out)) < 0.5
            self.blocks.append((masks, thresholds))

        # ---- precompute fused, padded kernel operands (done once) --------
        nb = len(self.blocks)
        w_all = jnp.zeros((nb, D_PAD, D_PAD), jnp.float32)
        # +big threshold in padded lanes -> padded outputs are always 0
        thr_all = jnp.full((nb, 1, D_PAD), 1e9, jnp.float32)
        for b, (masks, thresholds) in enumerate(self.blocks):
            di, do = masks.shape
            m = masks.astype(jnp.float32)
            w_all = w_all.at[b, :di, :do].set(2.0 * m - 1.0)     # +/-1 weights
            bias = jnp.sum(1.0 - m, axis=0)                      # sum_i(1-m)
            thr_all = thr_all.at[b, 0, :do].set(
                thresholds.astype(jnp.float32) - bias)           # folded thr
        self.w_all = w_all.astype(jnp.bfloat16)   # exact: values in {-1,0,+1}
        self.thr_all = thr_all                    # exact small ints in f32

        # bit -> RGB-int packing matrix (channel-major, LSB-first),
        # padded to 128 columns so the kernel's final store is lane-dense.
        pack = np.zeros((D_PAD, D_PAD), np.float32)
        for ch in range(3):
            for k in range(8):
                pack[ch * 8 + k, ch] = float(1 << k)             # exact in bf16
        self.pack = jnp.asarray(pack, jnp.bfloat16)

        # padded, flattened position-encoding bits (the network's fixed input)
        N = h * w
        x0 = jnp.zeros((N, D_PAD), jnp.bfloat16)
        x0 = x0.at[:, :P].set(pos_enc.reshape(-1, P).astype(jnp.bfloat16))
        self.x0 = x0

        # grid: 1 tile on single-TC chips, 2 parallel tiles on v7x; round the
        # tile to bf16-native sublane multiples (16), prefer multiples of 128.
        n_par = _num_parallel_tiles()
        tile = pl.cdiv(N, n_par)
        if tile >= 128:
            tile = -(-tile // 128) * 128
        else:
            tile = -(-tile // 16) * 16
        self.tile_m = int(min(tile, 1024))

        # advisory cost so XLA schedules the tiny custom call correctly
        self.cost = pl.CostEstimate(
            flops=int(2 * N * D_PAD * D_PAD * (nb + 1)),
            transcendentals=0,
            bytes_accessed=int(N * D_PAD * 2        # input bits (bf16)
                               + N * D_PAD * 4      # target image (f32)
                               + nb * D_PAD * D_PAD * 2   # weights (bf16)
                               + nb * D_PAD * 4           # thresholds (f32)
                               + D_PAD * D_PAD * 2        # pack matrix (bf16)
                               + N * D_PAD * 4))          # output (f32)

        # jit the whole forward: one fused launch for postamble + custom call
        self._forward_jit = jax.jit(self._forward_impl)

    def _forward_impl(self, image):
        h, w = self.hw
        N = h * w
        # lane-dense padded target image (RGB ints in lanes 0..2, 0 elsewhere)
        img_hwc = jnp.moveaxis(image, 0, -1).reshape(N, 3).astype(jnp.float32)
        img_p = jnp.zeros((N, D_PAD), jnp.float32).at[:, :3].set(img_hwc)

        out = fused_net_forward(self.x0, img_p, self.w_all, self.thr_all,
                                self.pack, self.tile_m, self.cost)   # (N,128) f32
        x_rgb = out[:, :3].astype(jnp.int32).reshape(h, w, 3)        # exact ints
        pixel_mae = jnp.sum(out[:, 3]) / (N * 3.0)                   # mean |diff|
        # TODO(synk): bit_error_cache / signed_bit_error omitted (backward-only
        # cache, never returned by forward; signed_bit_error is not defined in
        # the reference snippet).
        return jnp.transpose(x_rgb, (2, 0, 1)), pixel_mae            # (3,h,w), ()

    def forward(self, image):
        return self._forward_jit(image)


# ------------------------------- driver ------------------------------------

if __name__ == "__main__":
    key = jax.random.PRNGKey(0)
    key, k_img, k_model = jax.random.split(key, 3)

    # Small, consistent with the module: RGB image (3, 16, 16), uint8-valued.
    image = jax.random.randint(k_img, (3, 16, 16), 0, 256, dtype=jnp.int32)

    model = PallasModel(image, hidden_dim=32, num_blocks=3, key=k_model)
    x_rgb, pixel_mae = model.forward(image)

    jax.block_until_ready((x_rgb, pixel_mae))
    assert x_rgb.shape == (3, 16, 16)
    assert pixel_mae.shape == ()
    print("KERNEL_OK")
</pallas_src>

<mosaic_0001>
module attributes {stable_mosaic.version = 11 : i64} {
  func.func @_fused_net_kernel(%arg0: i32, %arg1: memref<256x128xbf16, #tpu.memory_space<vmem>>, %arg2: memref<256x128xf32, #tpu.memory_space<vmem>>, %arg3: memref<3x128x128xbf16, #tpu.memory_space<vmem>>, %arg4: memref<3x1x128xf32, #tpu.memory_space<vmem>>, %arg5: memref<128x128xbf16, #tpu.memory_space<vmem>>, %arg6: memref<256x128xf32, #tpu.memory_space<vmem>>) attributes {dimension_semantics = [#tpu.dimension_semantics<parallel>], iteration_bounds = array<i64: 1>, scalar_prefetch = 0 : i64, scratch_operands = 0 : i64, tpu.core_type = #tpu.core_type<tc>, window_params = [{transform_indices = @transform_0, window_bounds = array<i64: 256, 128>}, {transform_indices = @transform_1, window_bounds = array<i64: 256, 128>}, {pipeline_mode = #tpu.pipeline_mode<synchronous>, transform_indices = @transform_2, window_bounds = array<i64: 3, 128, 128>}, {pipeline_mode = #tpu.pipeline_mode<synchronous>, transform_indices = @transform_3, window_bounds = array<i64: 3, 1, 128>}, {pipeline_mode = #tpu.pipeline_mode<synchronous>, transform_indices = @transform_4, window_bounds = array<i64: 128, 128>}, {transform_indices = @transform_5, window_bounds = array<i64: 256, 128>}]} {
    %c0 = arith.constant 0 : index
    %c0_0 = arith.constant 0 : index
    %0 = vector.load %arg1[%c0, %c0_0] : memref<256x128xbf16, #tpu.memory_space<vmem>>, vector<256x128xbf16>
    %c0_1 = arith.constant 0 : index
    %c0_2 = arith.constant 0 : index
    %c0_3 = arith.constant 0 : index
    %1 = vector.load %arg3[%c0_1, %c0_2, %c0_3] : memref<3x128x128xbf16, #tpu.memory_space<vmem>>, vector<1x128x128xbf16>
    %2 = vector.shape_cast %1 : vector<1x128x128xbf16> to vector<128x128xbf16>
    %cst = arith.constant dense<0.000000e+00> : vector<256x128xf32>
    %3 = tpu.matmul %0, %2, %cst {dimension_numbers = #tpu.dot_dimension_numbers<[1], [0], [0], [1], [0, 0, 1, 1], [], []>} : vector<256x128xbf16>, vector<128x128xbf16>, vector<256x128xf32> -> vector<256x128xf32>
    %c0_4 = arith.constant 0 : index
    %c0_5 = arith.constant 0 : index
    %c0_6 = arith.constant 0 : index
    %4 = vector.load %arg4[%c0_4, %c0_5, %c0_6] : memref<3x1x128xf32, #tpu.memory_space<vmem>>, vector<1x1x128xf32>
    %5 = vector.shape_cast %4 : vector<1x1x128xf32> to vector<1x128xf32>
    %6 = vector.broadcast %5 : vector<1x128xf32> to vector<256x128xf32>
    %7 = arith.cmpf ogt, %3, %6 : vector<256x128xf32>
    %8 = arith.extui %7 : vector<256x128xi1> to vector<256x128xi32>
    %9 = arith.sitofp %8 : vector<256x128xi32> to vector<256x128xf32>
    %10 = arith.truncf %9 : vector<256x128xf32> to vector<256x128xbf16>
    %c1 = arith.constant 1 : index
    %c0_7 = arith.constant 0 : index
    %c0_8 = arith.constant 0 : index
    %11 = vector.load %arg3[%c1, %c0_7, %c0_8] : memref<3x128x128xbf16, #tpu.memory_space<vmem>>, vector<1x128x128xbf16>
    %12 = vector.shape_cast %11 : vector<1x128x128xbf16> to vector<128x128xbf16>
    %cst_9 = arith.constant dense<0.000000e+00> : vector<256x128xf32>
    %13 = tpu.matmul %10, %12, %cst_9 {dimension_numbers = #tpu.dot_dimension_numbers<[1], [0], [0], [1], [0, 0, 1, 1], [], []>} : vector<256x128xbf16>, vector<128x128xbf16>, vector<256x128xf32> -> vector<256x128xf32>
    %c1_10 = arith.constant 1 : index
    %c0_11 = arith.constant 0 : index
    %c0_12 = arith.constant 0 : index
    %14 = vector.load %arg4[%c1_10, %c0_11, %c0_12] : memref<3x1x128xf32, #tpu.memory_space<vmem>>, vector<1x1x128xf32>
    %15 = vector.shape_cast %14 : vector<1x1x128xf32> to vector<1x128xf32>
    %16 = vector.broadcast %15 : vector<1x128xf32> to vector<256x128xf32>
    %17 = arith.cmpf ogt, %13, %16 : vector<256x128xf32>
    %18 = arith.extui %17 : vector<256x128xi1> to vector<256x128xi32>
    %19 = arith.sitofp %18 : vector<256x128xi32> to vector<256x128xf32>
    %20 = arith.truncf %19 : vector<256x128xf32> to vector<256x128xbf16>
    %c2 = arith.constant 2 : index
    %c0_13 = arith.constant 0 : index
    %c0_14 = arith.constant 0 : index
    %21 = vector.load %arg3[%c2, %c0_13, %c0_14] : memref<3x128x128xbf16, #tpu.memory_space<vmem>>, vector<1x128x128xbf16>
    %22 = vector.shape_cast %21 : vector<1x128x128xbf16> to vector<128x128xbf16>
    %cst_15 = arith.constant dense<0.000000e+00> : vector<256x128xf32>
    %23 = tpu.matmul %20, %22, %cst_15 {dimension_numbers = #tpu.dot_dimension_numbers<[1], [0], [0], [1], [0, 0, 1, 1], [], []>} : vector<256x128xbf16>, vector<128x128xbf16>, vector<256x128xf32> -> vector<256x128xf32>
    %c2_16 = arith.constant 2 : index
    %c0_17 = arith.constant 0 : index
    %c0_18 = arith.constant 0 : index
    %24 = vector.load %arg4[%c2_16, %c0_17, %c0_18] : memref<3x1x128xf32, #tpu.memory_space<vmem>>, vector<1x1x128xf32>
    %25 = vector.shape_cast %24 : vector<1x1x128xf32> to vector<1x128xf32>
    %26 = vector.broadcast %25 : vector<1x128xf32> to vector<256x128xf32>
    %27 = arith.cmpf ogt, %23, %26 : vector<256x128xf32>
    %28 = arith.extui %27 : vector<256x128xi1> to vector<256x128xi32>
    %29 = arith.sitofp %28 : vector<256x128xi32> to vector<256x128xf32>
    %30 = arith.truncf %29 : vector<256x128xf32> to vector<256x128xbf16>
    %c0_19 = arith.constant 0 : index
    %c0_20 = arith.constant 0 : index
    %31 = vector.load %arg5[%c0_19, %c0_20] : memref<128x128xbf16, #tpu.memory_space<vmem>>, vector<128x128xbf16>
    %cst_21 = arith.constant dense<0.000000e+00> : vector<256x128xf32>
    %32 = tpu.matmul %30, %31, %cst_21 {dimension_numbers = #tpu.dot_dimension_numbers<[1], [0], [0], [1], [0, 0, 1, 1], [], []>} : vector<256x128xbf16>, vector<128x128xbf16>, vector<256x128xf32> -> vector<256x128xf32>
    %c0_22 = arith.constant 0 : index
    %c0_23 = arith.constant 0 : index
    %33 = vector.load %arg2[%c0_22, %c0_23] : memref<256x128xf32, #tpu.memory_space<vmem>>, vector<256x128xf32>
    %34 = arith.subf %32, %33 : vector<256x128xf32>
    %35 = math.absf %34 : vector<256x128xf32>
    %cst_24 = arith.constant dense<0.000000e+00> : vector<256xf32>
    %36 = vector.multi_reduction <add>, %35, %cst_24 [1] : vector<256x128xf32> to vector<256xf32>
    %37 = vector.shape_cast %36 : vector<256xf32> to vector<256x1xf32>
    %38 = tpu.iota {dimensions = array<i32: 1>} : vector<256x128xi32>
    %c3_i32 = arith.constant 3 : i32
    %39 = vector.broadcast %c3_i32 : i32 to vector<256x128xi32>
    %40 = arith.cmpi slt, %38, %39 : vector<256x128xi32>
    %c3_i32_25 = arith.constant 3 : i32
    %41 = vector.broadcast %c3_i32_25 : i32 to vector<256x128xi32>
    %42 = arith.cmpi eq, %38, %41 : vector<256x128xi32>
    %cst_26 = arith.constant 0.000000e+00 : f32
    %43 = vector.shape_cast %37 : vector<256x1xf32> to vector<256x1xf32>
    %44 = vector.broadcast %43 : vector<256x1xf32> to vector<256x128xf32>
    %45 = vector.broadcast %cst_26 : f32 to vector<256x128xf32>
    %46 = arith.select %42, %44, %45 : vector<256x128xi1>, vector<256x128xf32>
    %47 = arith.select %40, %32, %46 : vector<256x128xi1>, vector<256x128xf32>
    %c0_27 = arith.constant 0 : index
    %c0_28 = arith.constant 0 : index
    %48 = vector.load %arg6[%c0_27, %c0_28] : memref<256x128xf32, #tpu.memory_space<vmem>>, vector<256x128xf32>
    tpu.vector_store %arg6[%c0_27, %c0_28], %47 {strides = array<i32>} : memref<256x128xf32, #tpu.memory_space<vmem>>, vector<256x128xf32>,
    return
  }
  func.func @transform_0(%arg0: i32) -> (i32, i32) {
    %c0_i32 = arith.constant 0 : i32
    %c0_i32_0 = arith.constant 0 : i32
    return %arg0, %c0_i32 : i32, i32
  }
  func.func @transform_1(%arg0: i32) -> (i32, i32) {
    %c0_i32 = arith.constant 0 : i32
    %c0_i32_0 = arith.constant 0 : i32
    return %arg0, %c0_i32 : i32, i32
  }
  func.func @transform_2(%arg0: i32) -> (i32, i32, i32) {
    %c0_i32 = arith.constant 0 : i32
    %c0_i32_0 = arith.constant 0 : i32
    %c0_i32_1 = arith.constant 0 : i32
    %c0_i32_2 = arith.constant 0 : i32
    return %c0_i32, %c0_i32_0, %c0_i32_1 : i32, i32, i32
  }
  func.func @transform_3(%arg0: i32) -> (i32, i32, i32) {
    %c0_i32 = arith.constant 0 : i32
    %c0_i32_0 = arith.constant 0 : i32
    %c0_i32_1 = arith.constant 0 : i32
    %c0_i32_2 = arith.constant 0 : i32
    return %c0_i32, %c0_i32_0, %c0_i32_1 : i32, i32, i32
  }
  func.func @transform_4(%arg0: i32) -> (i32, i32) {
    %c0_i32 = arith.constant 0 : i32
    %c0_i32_0 = arith.constant 0 : i32
    %c0_i32_1 = arith.constant 0 : i32
    return %c0_i32, %c0_i32_0 : i32, i32
  }
  func.func @transform_5(%arg0: i32) -> (i32, i32) {
    %c0_i32 = arith.constant 0 : i32
    %c0_i32_0 = arith.constant 0 : i32
    return %arg0, %c0_i32 : i32, i32
  }
}

</mosaic_0001>

<bundles_post_ra>
// kernel: _forward_impl.1
= control target key start
LH: loop header
LB: loop body
LE: loop exit
PB: predicated region body
PF: predicated region fallthrough
CT: control target
= control target key end

     0   :  { %v1846_v28 = vmov 1.0|1.0   ;;  %s2632_s2 = inlined_call_operand.vmem [shape: bf16[3,128,128], index: 2, kind: input, shape index: {}]   ;;  %s2633_s3 = inlined_call_operand.vmem [shape: f32[3,1,128], index: 3, kind: input, shape index: {}]   ;;  %s2634_s0 = inlined_call_operand.vmem [shape: bf16[256,128], index: 0, kind: input, shape index: {}]   ;;  %s2635_s4 = inlined_call_operand.vmem [shape: bf16[128,128], index: 4, kind: input, shape index: {}]   ;;  %s2636_s1 = inlined_call_operand.vmem [shape: f32[256,128], index: 1, kind: input, shape index: {}]   ;;  %s2637_s5 = inlined_call_operand.vmem [shape: f32[256,128], index: 5, kind: output, shape index: {}]  }
   0x1   :  { %v1817_v0 = vld [vmem:[%s2632_s2 + $0x38] sm:$0xff]  ;;  %v1816_v1 = vld [vmem:[%s2632_s2 + $0x30] sm:$0xff]  ;;  %v1815_v2 = vld [vmem:[%s2632_s2 + $0x28] sm:$0xff] }
   0x2   :  { %212 = vmatpush.bf16.msra.mxu0 %v1817_v0  ;;  %v1814_v3 = vld [vmem:[%s2632_s2 + $0x20] sm:$0xff]  ;;  %v1813_v4 = vld [vmem:[%s2632_s2 + $0x18] sm:$0xff]  ;;  %v1812_v5 = vld [vmem:[%s2632_s2 + $0x10] sm:$0xff] }
   0x3   :  { %v1811_v6 = vld [vmem:[%s2632_s2 + $0x8] sm:$0xff]  ;;  %v1810_v7 = vld [vmem:[%s2632_s2] sm:$0xff]  ;;  %v1796_v10 = vld [vmem:[%s2634_s0 + $0x10] sm:$0xff] }
   0x4   :  { %v1794_v8 = vld [vmem:[%s2634_s0] sm:$0xff]  ;;  %v1795_v9 = vld [vmem:[%s2634_s0 + $0x8] sm:$0xff]  ;;  %v1797_v11 = vld [vmem:[%s2634_s0 + $0x18] sm:$0xff] }
   0x5   :  { %v1798_v12 = vld [vmem:[%s2634_s0 + $0x20] sm:$0xff]  ;;  %v1825_v13 = vld [vmem:[%s2632_s2 + $0x78] sm:$0xff]  ;;  %v1824_v14 = vld [vmem:[%s2632_s2 + $0x70] sm:$0xff] }
   0x6   :  { %213 = vmatpush.bf16.msra.mxu0 %v1816_v1  ;;  %482 = vmatpush.bf16.msra.mxu1 %v1825_v13  ;;  %v1799_v15 = vld [vmem:[%s2634_s0 + $0x28] sm:$0xff]  ;;  %v1822_v17 = vld [vmem:[%s2632_s2 + $0x60] sm:$0xff]  ;;  %v1821_v18 = vld [vmem:[%s2632_s2 + $0x58] sm:$0xff] }
   0x7   :  { %v1823_v16 = vld [vmem:[%s2632_s2 + $0x68] sm:$0xff]  ;;  %v1820_v19 = vld [vmem:[%s2632_s2 + $0x50] sm:$0xff]  ;;  %v1818_v22 = vld [vmem:[%s2632_s2 + $0x40] sm:$0xff] }
   0x8   :  { %v1800_v20 = vld [vmem:[%s2634_s0 + $0x30] sm:$0xff]  ;;  %v1819_v21 = vld [vmem:[%s2632_s2 + $0x48] sm:$0xff]  ;;  %v1801_v23 = vld [vmem:[%s2634_s0 + $0x38] sm:$0xff] }
   0x9   :  { %v1802_v24 = vld [vmem:[%s2634_s0 + $0x40] sm:$0xff]  ;;  %v1803_v29 = vld [vmem:[%s2634_s0 + $0x48] sm:$0xff]  ;;  %v1804_v32 = vld [vmem:[%s2634_s0 + $0x50] sm:$0xff] }
   0xa   :  { %214 = vmatpush.bf16.msra.mxu0 %v1815_v2  ;;  %483 = vmatpush.bf16.msra.mxu1 %v1824_v14  ;;  %v1955_v26 = vld [vmem:[%s2633_s3] ss:$0 sm:$0xff]  ;;  %v1805_v35 = vld [vmem:[%s2634_s0 + $0x58] sm:$0xff]  ;;  %v1807_v41 = vld [vmem:[%s2634_s0 + $0x68] sm:$0xff] }
   0xb   :  { %v1806_v38 = vld [vmem:[%s2634_s0 + $0x60] sm:$0xff]  ;;  %v1833_v43 = vld [vmem:[%s2632_s2 + $0xb8] sm:$0xff]  ;;  %v1832_v44 = vld [vmem:[%s2632_s2 + $0xb0] sm:$0xff] }
   0xc   :  { %753 = vmatpush.bf16.msra.mxu2 %v1833_v43  ;;  %v1831_v46 = vld [vmem:[%s2632_s2 + $0xa8] sm:$0xff]  ;;  %v1830_v47 = vld [vmem:[%s2632_s2 + $0xa0] sm:$0xff]  ;;  %v1808_v48 = vld [vmem:[%s2634_s0 + $0x70] sm:$0xff] }
   0xd   :  { %v1829_v50 = vld [vmem:[%s2632_s2 + $0x98] sm:$0xff]  ;;  %v1828_v51 = vld [vmem:[%s2632_s2 + $0x90] sm:$0xff]  ;;  %v1827_v53 = vld [vmem:[%s2632_s2 + $0x88] sm:$0xff] }
   0xe   :  { %215 = vmatpush.bf16.msra.mxu0 %v1814_v3  ;;  %484 = vmatpush.bf16.msra.mxu1 %v1823_v16  ;;  %v1826_v54 = vld [vmem:[%s2632_s2 + $0x80] sm:$0xff]  ;;  %v1809_v55 = vld [vmem:[%s2634_s0 + $0x78] sm:$0xff] }
   0xf   :  { %v2032_v61 = vld [vmem:[%s2633_s3 + $0x1] ss:$0 sm:$0xff] }
  0x10   :  { %754 = vmatpush.bf16.msra.mxu2 %v1832_v44 }
  0x12   :  { %216 = vmatpush.bf16.msra.mxu0 %v1813_v4  ;;  %485 = vmatpush.bf16.msra.mxu1 %v1822_v17 }
  0x14   :  { %755 = vmatpush.bf16.msra.mxu2 %v1831_v46 }
  0x16   :  { %217 = vmatpush.bf16.msra.mxu0 %v1812_v5  ;;  %486 = vmatpush.bf16.msra.mxu1 %v1821_v18 }
  0x18   :  { %756 = vmatpush.bf16.msra.mxu2 %v1830_v47 }
  0x1a   :  { %218 = vmatpush.bf16.msra.mxu0 %v1811_v6  ;;  %487 = vmatpush.bf16.msra.mxu1 %v1820_v19 }
  0x1c   :  { %757 = vmatpush.bf16.msra.mxu2 %v1829_v50 }
  0x1e   :  { %219 = vmatpush.bf16.msra.mxu0 %v1810_v7  ;;  %488 = vmatpush.bf16.msra.mxu1 %v1819_v21  ;;  %v1840_v21 = vld [vmem:[%s2635_s4 + $0x30] sm:$0xff] }
  0x20   :  { %758 = vmatpush.bf16.msra.mxu2 %v1828_v51 }
  0x21   :  { %220 = vmatmul.bf16.vlgmr.msra.gmra.mxu0 %v1794_v8 }
  0x22   :  { %489 = vmatpush.bf16.msra.mxu1 %v1818_v22 }
  0x24   :  { %759 = vmatpush.bf16.msra.mxu2 %v1827_v53 }
  0x28   :  { %760 = vmatpush.bf16.msra.mxu2 %v1826_v54 }
  0x31   :  { %225 = vmatmul.bf16.gmra.mxu0 %v1795_v9 }
  0x41   :  { %230 = vmatmul.bf16.gmra.mxu0 %v1796_v10 }
  0x51   :  { %235 = vmatmul.bf16.gmra.mxu0 %v1797_v11 }
  0x61   :  { %240 = vmatmul.bf16.gmra.mxu0 %v1798_v12 }
  0x71   :  { %245 = vmatmul.bf16.gmra.mxu0 %v1799_v15 }
  0x81   :  { %250 = vmatmul.bf16.gmra.mxu0 %v1800_v20  ;;  %v1841_v20 = vld [vmem:[%s2635_s4 + $0x38] sm:$0xff] }
  0x82   :  { %1023 = vmatpush.bf16.msra.mxu3 %v1841_v20 }
  0x86   :  { %1024 = vmatpush.bf16.msra.mxu3 %v1840_v21 }
  0x91   :  { %255 = vmatmul.bf16.gmra.mxu0 %v1801_v23 }
  0x9e   :  { %v221_v25 = vpop.f32.mrf.mxu0 }
  0x9f   :  { %vm305_vm0 = vcmp.gt.f32.partialorder %v221_v25, %v1955_v26  ;;  %v1838_v25 = vld [vmem:[%s2635_s4 + $0x20] sm:$0xff] }
  0xa1   :  { %260 = vmatmul.bf16.gmra.mxu0 %v1802_v24  ;;  %v1839_v24 = vld [vmem:[%s2635_s4 + $0x28] sm:$0xff] }
  0xa2   :  { %1025 = vmatpush.bf16.msra.mxu3 %v1839_v24 }
  0xa6   :  { %v223_v27 = vpop.f32.mrf.mxu0  ;;  %1026 = vmatpush.bf16.msra.mxu3 %v1838_v25 }
  0xa7   :  { %vm306_vm1 = vcmp.gt.f32.partialorder %v223_v27, %v1955_v26 }
  0xa8   :  { %vm1552_vm2 = vmpackc.low %vm306_vm1, %vm305_vm0 }
  0xa9   :  { %1553 = vmatmul.msk.bf16.vlgmr.msra.gmra.mxu1 %vm1552_vm2, %v1846_v28 }
  0xae   :  { %v226_v30 = vpop.f32.mrf.mxu0 }
  0xaf   :  { %vm307_vm3 = vcmp.gt.f32.partialorder %v226_v30, %v1955_v26  ;;  %v1837_v30 = vld [vmem:[%s2635_s4 + $0x18] sm:$0xff] }
  0xb0   :  { %1027 = vmatpush.bf16.msra.mxu3 %v1837_v30 }
  0xb1   :  { %265 = vmatmul.bf16.gmra.mxu0 %v1803_v29 }
  0xb6   :  { %v228_v31 = vpop.f32.mrf.mxu0 }
  0xb7   :  { %vm308_vm4 = vcmp.gt.f32.partialorder %v228_v31, %v1955_v26  ;;  %v1836_v31 = vld [vmem:[%s2635_s4 + $0x10] sm:$0xff] }
  0xb8   :  { %vm1554_vm5 = vmpackc.low %vm308_vm4, %vm307_vm3  ;;  %1028 = vmatpush.bf16.msra.mxu3 %v1836_v31 }
  0xb9   :  { %1555 = vmatmul.msk.bf16.gmra.mxu1 %vm1554_vm5, %v1846_v28 }
  0xbe   :  { %v231_v33 = vpop.f32.mrf.mxu0 }
  0xbf   :  { %vm309_vm6 = vcmp.gt.f32.partialorder %v231_v33, %v1955_v26 }
  0xc1   :  { %270 = vmatmul.bf16.gmra.mxu0 %v1804_v32 }
  0xc6   :  { %v233_v34 = vpop.f32.mrf.mxu0 }
  0xc7   :  { %vm310_vm7 = vcmp.gt.f32.partialorder %v233_v34, %v1955_v26  ;;  %v1835_v34 = vld [vmem:[%s2635_s4 + $0x8] sm:$0xff] }
  0xc8   :  { %vm1556_vm8 = vmpackc.low %vm310_vm7, %vm309_vm6  ;;  %1029 = vmatpush.bf16.msra.mxu3 %v1835_v34  ;;  %v1117_v34 = vld [vmem:[%s2636_s1 + $0x28] sm:$0xff] }
  0xc9   :  { %1557 = vmatmul.msk.bf16.gmra.mxu1 %vm1556_vm8, %v1846_v28 }
  0xce   :  { %v236_v36 = vpop.f32.mrf.mxu0 }
  0xcf   :  { %vm311_vm9 = vcmp.gt.f32.partialorder %v236_v36, %v1955_v26 }
  0xd1   :  { %275 = vmatmul.bf16.gmra.mxu0 %v1805_v35  ;;  %v1834_v35 = vld [vmem:[%s2635_s4] sm:$0xff] }
  0xd2   :  { %1030 = vmatpush.bf16.msra.mxu3 %v1834_v35 }
  0xd6   :  { %v238_v37 = vpop.f32.mrf.mxu0 }
  0xd7   :  { %vm312_vm10 = vcmp.gt.f32.partialorder %v238_v37, %v1955_v26 }
  0xd8   :  { %vm1558_vm11 = vmpackc.low %vm312_vm10, %vm311_vm9 }
  0xd9   :  { %1559 = vmatmul.msk.bf16.gmra.mxu1 %vm1558_vm11, %v1846_v28 }
  0xde   :  { %v241_v39 = vpop.f32.mrf.mxu0 }
  0xdf   :  { %vm313_vm12 = vcmp.gt.f32.partialorder %v241_v39, %v1955_v26 }
  0xe1   :  { %280 = vmatmul.bf16.gmra.mxu0 %v1806_v38 }
  0xe6   :  { %v243_v40 = vpop.f32.mrf.mxu0 }
  0xe7   :  { %vm314_vm13 = vcmp.gt.f32.partialorder %v243_v40, %v1955_v26  ;;  %v2109_v40 = vld [vmem:[%s2633_s3 + $0x2] ss:$0 sm:$0xff] }
  0xe8   :  { %vm1560_vm14 = vmpackc.low %vm314_vm13, %vm313_vm12 }
  0xe9   :  { %1561 = vmatmul.msk.bf16.gmra.mxu1 %vm1560_vm14, %v1846_v28 }
  0xee   :  { %v246_v42 = vpop.f32.mrf.mxu0 }
  0xef   :  { %vm315_vm15 = vcmp.gt.f32.partialorder %v246_v42, %v1955_v26 }
  0xf1   :  { %285 = vmatmul.bf16.gmra.mxu0 %v1807_v41 }
  0xf6   :  { %v248_v45 = vpop.f32.mrf.mxu0 }
  0xf7   :  { %vm316_vm0 = vcmp.gt.f32.partialorder %v248_v45, %v1955_v26 }
  0xf8   :  { %vm1562_vm1 = vmpackc.low %vm316_vm0, %vm315_vm15 }
  0xf9   :  { %1563 = vmatmul.msk.bf16.gmra.mxu1 %vm1562_vm1, %v1846_v28 }
  0xfe   :  { %v251_v49 = vpop.f32.mrf.mxu0 }
  0xff   :  { %vm317_vm2 = vcmp.gt.f32.partialorder %v251_v49, %v1955_v26 }
 0x101   :  { %290 = vmatmul.bf16.gmra.mxu0 %v1808_v48 }
 0x106   :  { %v253_v52 = vpop.f32.mrf.mxu0 }
 0x107   :  { %vm318_vm3 = vcmp.gt.f32.partialorder %v253_v52, %v1955_v26 }
 0x108   :  { %vm1564_vm4 = vmpackc.low %vm318_vm3, %vm317_vm2 }
 0x109   :  { %1565 = vmatmul.msk.bf16.gmra.mxu1 %vm1564_vm4, %v1846_v28 }
 0x10e   :  { %v256_v56 = vpop.f32.mrf.mxu0 }
 0x10f   :  { %vm319_vm5 = vcmp.gt.f32.partialorder %v256_v56, %v1955_v26 }
 0x111   :  { %295 = vmatmul.bf16.gmra.mxu0 %v1809_v55 }
 0x116   :  { %v258_v57 = vpop.f32.mrf.mxu0 }
 0x117   :  { %vm320_vm6 = vcmp.gt.f32.partialorder %v258_v57, %v1955_v26 }
 0x118   :  { %vm1566_vm7 = vmpackc.low %vm320_vm6, %vm319_vm5 }
 0x119   :  { %1567 = vmatmul.msk.bf16.gmra.mxu1 %vm1566_vm7, %v1846_v28 }
 0x11e   :  { %v261_v58 = vpop.f32.mrf.mxu0 }
 0x11f   :  { %vm321_vm8 = vcmp.gt.f32.partialorder %v261_v58, %v1955_v26 }
 0x126   :  { %v263_v59 = vpop.f32.mrf.mxu0  ;;  %v491_v60 = vpop.f32.mrf.mxu1 }
 0x127   :  { %vm322_vm9 = vcmp.gt.f32.partialorder %v263_v59, %v1955_v26  ;;  %vm576_vm11 = vcmp.gt.f32.partialorder %v491_v60, %v2032_v61 }
 0x128   :  { %vm1568_vm10 = vmpackc.low %vm322_vm9, %vm321_vm8 }
 0x129   :  { %1569 = vmatmul.msk.bf16.gmra.mxu1 %vm1568_vm10, %v1846_v28 }
 0x12e   :  { %v266_v62 = vpop.f32.mrf.mxu0  ;;  %v493_v63 = vpop.f32.mrf.mxu1 }
 0x12f   :  { %vm577_vm12 = vcmp.gt.f32.partialorder %v493_v63, %v2032_v61  ;;  %vm323_vm14 = vcmp.gt.f32.partialorder %v266_v62, %v1955_v26 }
 0x130   :  { %vm1665_vm13 = vmpackc.low %vm577_vm12, %vm576_vm11 }
 0x131   :  { %1666 = vmatmul.msk.bf16.vlgmr.msra.gmra.mxu2 %vm1665_vm13, %v1846_v28 }
 0x136   :  { %v268_v0 = vpop.f32.mrf.mxu0  ;;  %v496_v1 = vpop.f32.mrf.mxu1 }
 0x137   :  { %vm324_vm15 = vcmp.gt.f32.partialorder %v268_v0, %v1955_v26  ;;  %vm578_vm1 = vcmp.gt.f32.partialorder %v496_v1, %v2032_v61 }
 0x138   :  { %vm1570_vm0 = vmpackc.low %vm324_vm15, %vm323_vm14 }
 0x139   :  { %1571 = vmatmul.msk.bf16.gmra.mxu1 %vm1570_vm0, %v1846_v28 }
 0x13e   :  { %v271_v2 = vpop.f32.mrf.mxu0  ;;  %v498_v3 = vpop.f32.mrf.mxu1 }
 0x13f   :  { %vm579_vm2 = vcmp.gt.f32.partialorder %v498_v3, %v2032_v61  ;;  %vm325_vm4 = vcmp.gt.f32.partialorder %v271_v2, %v1955_v26 }
 0x140   :  { %vm1667_vm3 = vmpackc.low %vm579_vm2, %vm578_vm1 }
 0x141   :  { %1668 = vmatmul.msk.bf16.gmra.mxu2 %vm1667_vm3, %v1846_v28 }
 0x146   :  { %v273_v4 = vpop.f32.mrf.mxu0  ;;  %v501_v5 = vpop.f32.mrf.mxu1 }
 0x147   :  { %vm326_vm5 = vcmp.gt.f32.partialorder %v273_v4, %v1955_v26  ;;  %vm580_vm7 = vcmp.gt.f32.partialorder %v501_v5, %v2032_v61 }
 0x148   :  { %vm1572_vm6 = vmpackc.low %vm326_vm5, %vm325_vm4 }
 0x149   :  { %1573 = vmatmul.msk.bf16.gmra.mxu1 %vm1572_vm6, %v1846_v28 }
 0x14e   :  { %v276_v6 = vpop.f32.mrf.mxu0  ;;  %v503_v7 = vpop.f32.mrf.mxu1 }
 0x14f   :  { %vm581_vm8 = vcmp.gt.f32.partialorder %v503_v7, %v2032_v61  ;;  %vm327_vm10 = vcmp.gt.f32.partialorder %v276_v6, %v1955_v26 }
 0x150   :  { %vm1669_vm9 = vmpackc.low %vm581_vm8, %vm580_vm7 }
 0x151   :  { %1670 = vmatmul.msk.bf16.gmra.mxu2 %vm1669_vm9, %v1846_v28 }
 0x156   :  { %v278_v8 = vpop.f32.mrf.mxu0  ;;  %v506_v9 = vpop.f32.mrf.mxu1 }
 0x157   :  { %vm328_vm11 = vcmp.gt.f32.partialorder %v278_v8, %v1955_v26  ;;  %vm582_vm13 = vcmp.gt.f32.partialorder %v506_v9, %v2032_v61 }
 0x158   :  { %vm1574_vm12 = vmpackc.low %vm328_vm11, %vm327_vm10 }
 0x159   :  { %1575 = vmatmul.msk.bf16.gmra.mxu1 %vm1574_vm12, %v1846_v28 }
 0x15e   :  { %v281_v10 = vpop.f32.mrf.mxu0  ;;  %v508_v11 = vpop.f32.mrf.mxu1 }
 0x15f   :  { %vm583_vm14 = vcmp.gt.f32.partialorder %v508_v11, %v2032_v61  ;;  %vm329_vm0 = vcmp.gt.f32.partialorder %v281_v10, %v1955_v26 }
 0x160   :  { %vm1671_vm15 = vmpackc.low %vm583_vm14, %vm582_vm13 }
 0x161   :  { %1672 = vmatmul.msk.bf16.gmra.mxu2 %vm1671_vm15, %v1846_v28 }
 0x166   :  { %v283_v12 = vpop.f32.mrf.mxu0  ;;  %v511_v13 = vpop.f32.mrf.mxu1 }
 0x167   :  { %vm330_vm1 = vcmp.gt.f32.partialorder %v283_v12, %v1955_v26  ;;  %vm584_vm3 = vcmp.gt.f32.partialorder %v511_v13, %v2032_v61  ;;  %v1113_v12 = vld [vmem:[%s2636_s1 + $0x8] sm:$0xff] }
 0x168   :  { %vm1576_vm2 = vmpackc.low %vm330_vm1, %vm329_vm0 }
 0x169   :  { %1577 = vmatmul.msk.bf16.gmra.mxu1 %vm1576_vm2, %v1846_v28 }
 0x16e   :  { %v286_v14 = vpop.f32.mrf.mxu0  ;;  %v513_v15 = vpop.f32.mrf.mxu1 }
 0x16f   :  { %vm585_vm4 = vcmp.gt.f32.partialorder %v513_v15, %v2032_v61  ;;  %vm331_vm6 = vcmp.gt.f32.partialorder %v286_v14, %v1955_v26 }
 0x170   :  { %vm1673_vm5 = vmpackc.low %vm585_vm4, %vm584_vm3 }
 0x171   :  { %1674 = vmatmul.msk.bf16.gmra.mxu2 %vm1673_vm5, %v1846_v28 }
 0x176   :  { %v288_v16 = vpop.f32.mrf.mxu0  ;;  %v516_v17 = vpop.f32.mrf.mxu1 }
 0x177   :  { %vm332_vm7 = vcmp.gt.f32.partialorder %v288_v16, %v1955_v26  ;;  %vm586_vm9 = vcmp.gt.f32.partialorder %v516_v17, %v2032_v61  ;;  %v1114_v17 = vld [vmem:[%s2636_s1 + $0x10] sm:$0xff] }
 0x178   :  { %vm1578_vm8 = vmpackc.low %vm332_vm7, %vm331_vm6 }
 0x179   :  { %1579 = vmatmul.msk.bf16.gmra.mxu1 %vm1578_vm8, %v1846_v28 }
 0x17e   :  { %v291_v18 = vpop.f32.mrf.mxu0  ;;  %v518_v19 = vpop.f32.mrf.mxu1 }
 0x17f   :  { %vm587_vm10 = vcmp.gt.f32.partialorder %v518_v19, %v2032_v61  ;;  %vm333_vm12 = vcmp.gt.f32.partialorder %v291_v18, %v1955_v26 }
 0x180   :  { %vm1675_vm11 = vmpackc.low %vm587_vm10, %vm586_vm9 }
 0x181   :  { %1676 = vmatmul.msk.bf16.gmra.mxu2 %vm1675_vm11, %v1846_v28 }
 0x186   :  { %v293_v22 = vpop.f32.mrf.mxu0  ;;  %v521_v23 = vpop.f32.mrf.mxu1 }
 0x187   :  { %vm334_vm13 = vcmp.gt.f32.partialorder %v293_v22, %v1955_v26  ;;  %vm588_vm15 = vcmp.gt.f32.partialorder %v521_v23, %v2032_v61  ;;  %v1115_v22 = vld [vmem:[%s2636_s1 + $0x18] sm:$0xff] }
 0x188   :  { %vm1580_vm14 = vmpackc.low %vm334_vm13, %vm333_vm12 }
 0x189   :  { %1581 = vmatmul.msk.bf16.gmra.mxu1 %vm1580_vm14, %v1846_v28 }
 0x18e   :  { %v296_v27 = vpop.f32.mrf.mxu0  ;;  %v523_v29 = vpop.f32.mrf.mxu1 }
 0x18f   :  { %vm589_vm0 = vcmp.gt.f32.partialorder %v523_v29, %v2032_v61  ;;  %vm335_vm2 = vcmp.gt.f32.partialorder %v296_v27, %v1955_v26  ;;  %v1116_v29 = vld [vmem:[%s2636_s1 + $0x20] sm:$0xff] }
 0x190   :  { %vm1677_vm1 = vmpackc.low %vm589_vm0, %vm588_vm15 }
 0x191   :  { %1678 = vmatmul.msk.bf16.gmra.mxu2 %vm1677_vm1, %v1846_v28 }
 0x196   :  { %v298_v32 = vpop.f32.mrf.mxu0  ;;  %v526_v33 = vpop.f32.mrf.mxu1 }
 0x197   :  { %vm336_vm3 = vcmp.gt.f32.partialorder %v298_v32, %v1955_v26  ;;  %vm590_vm5 = vcmp.gt.f32.partialorder %v526_v33, %v2032_v61 }
 0x198   :  { %vm1582_vm4 = vmpackc.low %vm336_vm3, %vm335_vm2 }
 0x199   :  { %1583 = vmatmul.msk.bf16.gmra.mxu1 %vm1582_vm4, %v1846_v28 }
 0x19e   :  { %v528_v36 = vpop.f32.mrf.mxu1 }
 0x19f   :  { %vm591_vm6 = vcmp.gt.f32.partialorder %v528_v36, %v2032_v61 }
 0x1a0   :  { %vm1679_vm7 = vmpackc.low %vm591_vm6, %vm590_vm5 }
 0x1a1   :  { %1680 = vmatmul.msk.bf16.gmra.mxu2 %vm1679_vm7, %v1846_v28 }
 0x1a6   :  { %v531_v37 = vpop.f32.mrf.mxu1 }
 0x1a7   :  { %vm592_vm8 = vcmp.gt.f32.partialorder %v531_v37, %v2032_v61 }
 0x1ae   :  { %v533_v38 = vpop.f32.mrf.mxu1 }
 0x1af   :  { %vm593_vm9 = vcmp.gt.f32.partialorder %v533_v38, %v2032_v61 }
 0x1b0   :  { %vm1681_vm10 = vmpackc.low %vm593_vm9, %vm592_vm8 }
 0x1b1   :  { %1682 = vmatmul.msk.bf16.gmra.mxu2 %vm1681_vm10, %v1846_v28 }
 0x1b4   :  { %v762_v26 = vpop.f32.mrf.mxu2 }
 0x1b5   :  { %vm847_vm11 = vcmp.gt.f32.partialorder %v762_v26, %v2109_v40  ;;  %v1118_v26 = vld [vmem:[%s2636_s1 + $0x30] sm:$0xff] }
 0x1b6   :  { %v536_v39 = vpop.f32.mrf.mxu1 }
 0x1b7   :  { %vm594_vm14 = vcmp.gt.f32.partialorder %v536_v39, %v2032_v61 }
 0x1bc   :  { %v764_v41 = vpop.f32.mrf.mxu2 }
 0x1bd   :  { %vm848_vm12 = vcmp.gt.f32.partialorder %v764_v41, %v2109_v40 }
 0x1be   :  { %v538_v42 = vpop.f32.mrf.mxu1  ;;  %vm1762_vm13 = vmpackc.low %vm848_vm12, %vm847_vm11 }
 0x1bf   :  { %vm595_vm15 = vcmp.gt.f32.partialorder %v538_v42, %v2032_v61  ;;  %1763 = vmatmul.msk.bf16.vlgmr.msra.gmra.mxu3 %vm1762_vm13, %v1846_v28 }
 0x1c0   :  { %vm1683_vm0 = vmpackc.low %vm595_vm15, %vm594_vm14 }
 0x1c1   :  { %1684 = vmatmul.msk.bf16.gmra.mxu2 %vm1683_vm0, %v1846_v28 }
 0x1c4   :  { %v767_v43 = vpop.f32.mrf.mxu2 }
 0x1c5   :  { %vm849_vm1 = vcmp.gt.f32.partialorder %v767_v43, %v2109_v40 }
 0x1c6   :  { %v541_v44 = vpop.f32.mrf.mxu1 }
 0x1c7   :  { %vm596_vm4 = vcmp.gt.f32.partialorder %v541_v44, %v2032_v61  ;;  %v1119_v44 = vld [vmem:[%s2636_s1 + $0x38] sm:$0xff] }
 0x1cc   :  { %v769_v45 = vpop.f32.mrf.mxu2 }
 0x1cd   :  { %vm850_vm2 = vcmp.gt.f32.partialorder %v769_v45, %v2109_v40 }
 0x1ce   :  { %v543_v46 = vpop.f32.mrf.mxu1  ;;  %vm1764_vm3 = vmpackc.low %vm850_vm2, %vm849_vm1 }
 0x1cf   :  { %vm597_vm5 = vcmp.gt.f32.partialorder %v543_v46, %v2032_v61  ;;  %1765 = vmatmul.msk.bf16.gmra.mxu3 %vm1764_vm3, %v1846_v28 }
 0x1d0   :  { %vm1685_vm6 = vmpackc.low %vm597_vm5, %vm596_vm4 }
 0x1d1   :  { %1686 = vmatmul.msk.bf16.gmra.mxu2 %vm1685_vm6, %v1846_v28 }
 0x1d4   :  { %v772_v47 = vpop.f32.mrf.mxu2 }
 0x1d5   :  { %vm851_vm7 = vcmp.gt.f32.partialorder %v772_v47, %v2109_v40 }
 0x1d6   :  { %v546_v48 = vpop.f32.mrf.mxu1 }
 0x1d7   :  { %vm598_vm10 = vcmp.gt.f32.partialorder %v546_v48, %v2032_v61 }
 0x1dc   :  { %v774_v49 = vpop.f32.mrf.mxu2 }
 0x1dd   :  { %vm852_vm8 = vcmp.gt.f32.partialorder %v774_v49, %v2109_v40  ;;  %v1120_v49 = vld [vmem:[%s2636_s1 + $0x40] sm:$0xff] }
 0x1de   :  { %v548_v50 = vpop.f32.mrf.mxu1  ;;  %vm1766_vm9 = vmpackc.low %vm852_vm8, %vm851_vm7 }
 0x1df   :  { %vm599_vm11 = vcmp.gt.f32.partialorder %v548_v50, %v2032_v61  ;;  %1767 = vmatmul.msk.bf16.gmra.mxu3 %vm1766_vm9, %v1846_v28 }
 0x1e0   :  { %vm1687_vm12 = vmpackc.low %vm599_vm11, %vm598_vm10 }
 0x1e1   :  { %1688 = vmatmul.msk.bf16.gmra.mxu2 %vm1687_vm12, %v1846_v28 }
 0x1e4   :  { %v777_v51 = vpop.f32.mrf.mxu2 }
 0x1e5   :  { %vm853_vm13 = vcmp.gt.f32.partialorder %v777_v51, %v2109_v40 }
 0x1e6   :  { %v551_v52 = vpop.f32.mrf.mxu1 }
 0x1e7   :  { %vm600_vm0 = vcmp.gt.f32.partialorder %v551_v52, %v2032_v61 }
 0x1ec   :  { %v779_v53 = vpop.f32.mrf.mxu2 }
 0x1ed   :  { %vm854_vm14 = vcmp.gt.f32.partialorder %v779_v53, %v2109_v40 }
 0x1ee   :  { %v553_v54 = vpop.f32.mrf.mxu1  ;;  %vm1768_vm15 = vmpackc.low %vm854_vm14, %vm853_vm13 }
 0x1ef   :  { %vm601_vm1 = vcmp.gt.f32.partialorder %v553_v54, %v2032_v61  ;;  %1769 = vmatmul.msk.bf16.gmra.mxu3 %vm1768_vm15, %v1846_v28  ;;  %v1121_v54 = vld [vmem:[%s2636_s1 + $0x48] sm:$0xff] }
 0x1f0   :  { %vm1689_vm2 = vmpackc.low %vm601_vm1, %vm600_vm0 }
 0x1f1   :  { %1690 = vmatmul.msk.bf16.gmra.mxu2 %vm1689_vm2, %v1846_v28 }
 0x1f4   :  { %v782_v55 = vpop.f32.mrf.mxu2 }
 0x1f5   :  { %vm855_vm3 = vcmp.gt.f32.partialorder %v782_v55, %v2109_v40 }
 0x1f6   :  { %v556_v56 = vpop.f32.mrf.mxu1 }
 0x1f7   :  { %vm602_vm6 = vcmp.gt.f32.partialorder %v556_v56, %v2032_v61 }
 0x1fc   :  { %v784_v57 = vpop.f32.mrf.mxu2 }
 0x1fd   :  { %vm856_vm4 = vcmp.gt.f32.partialorder %v784_v57, %v2109_v40 }
 0x1fe   :  { %vm1770_vm5 = vmpackc.low %vm856_vm4, %vm855_vm3  ;;  %v558_v58 = vpop.f32.mrf.mxu1 }
 0x1ff   :  { %vm603_vm7 = vcmp.gt.f32.partialorder %v558_v58, %v2032_v61  ;;  %1771 = vmatmul.msk.bf16.gmra.mxu3 %vm1770_vm5, %v1846_v28 }
 0x200   :  { %vm1691_vm8 = vmpackc.low %vm603_vm7, %vm602_vm6 }
 0x201   :  { %1692 = vmatmul.msk.bf16.gmra.mxu2 %vm1691_vm8, %v1846_v28 }
 0x204   :  { %v787_v59 = vpop.f32.mrf.mxu2 }
 0x205   :  { %vm857_vm9 = vcmp.gt.f32.partialorder %v787_v59, %v2109_v40  ;;  %v1122_v59 = vld [vmem:[%s2636_s1 + $0x50] sm:$0xff] }
 0x206   :  { %v561_v60 = vpop.f32.mrf.mxu1 }
 0x207   :  { %vm604_vm12 = vcmp.gt.f32.partialorder %v561_v60, %v2032_v61 }
 0x20c   :  { %v789_v62 = vpop.f32.mrf.mxu2 }
 0x20d   :  { %vm858_vm10 = vcmp.gt.f32.partialorder %v789_v62, %v2109_v40 }
 0x20e   :  { %vm1772_vm11 = vmpackc.low %vm858_vm10, %vm857_vm9  ;;  %v563_v63 = vpop.f32.mrf.mxu1 }
 0x20f   :  { %vm605_vm13 = vcmp.gt.f32.partialorder %v563_v63, %v2032_v61  ;;  %1773 = vmatmul.msk.bf16.gmra.mxu3 %vm1772_vm11, %v1846_v28 }
 0x210   :  { %vm1693_vm14 = vmpackc.low %vm605_vm13, %vm604_vm12 }
 0x211   :  { %1694 = vmatmul.msk.bf16.gmra.mxu2 %vm1693_vm14, %v1846_v28 }
 0x214   :  { %v792_v0 = vpop.f32.mrf.mxu2 }
 0x215   :  { %vm859_vm15 = vcmp.gt.f32.partialorder %v792_v0, %v2109_v40 }
 0x216   :  { %v566_v1 = vpop.f32.mrf.mxu1 }
 0x217   :  { %vm606_vm2 = vcmp.gt.f32.partialorder %v566_v1, %v2032_v61  ;;  %v1123_v1 = vld [vmem:[%s2636_s1 + $0x58] sm:$0xff] }
 0x21c   :  { %v794_v2 = vpop.f32.mrf.mxu2 }
 0x21d   :  { %vm860_vm0 = vcmp.gt.f32.partialorder %v794_v2, %v2109_v40 }
 0x21e   :  { %vm1774_vm1 = vmpackc.low %vm860_vm0, %vm859_vm15  ;;  %v568_v3 = vpop.f32.mrf.mxu1 }
 0x21f   :  { %vm607_vm3 = vcmp.gt.f32.partialorder %v568_v3, %v2032_v61  ;;  %1775 = vmatmul.msk.bf16.gmra.mxu3 %vm1774_vm1, %v1846_v28  ;;  %v1112_v61 = vld [vmem:[%s2636_s1] sm:$0xff] }
 0x220   :  { %vm1695_vm4 = vmpackc.low %vm607_vm3, %vm606_vm2 }
 0x221   :  { %1696 = vmatmul.msk.bf16.gmra.mxu2 %vm1695_vm4, %v1846_v28 }
 0x224   :  { %v797_v4 = vpop.f32.mrf.mxu2 }
 0x225   :  { %vm861_vm5 = vcmp.gt.f32.partialorder %v797_v4, %v2109_v40 }
 0x22c   :  { %v799_v5 = vpop.f32.mrf.mxu2 }
 0x22d   :  { %vm862_vm6 = vcmp.gt.f32.partialorder %v799_v5, %v2109_v40 }
 0x22e   :  { %vm1776_vm7 = vmpackc.low %vm862_vm6, %vm861_vm5 }
 0x22f   :  { %1777 = vmatmul.msk.bf16.gmra.mxu3 %vm1776_vm7, %v1846_v28 }
 0x234   :  { %v802_v6 = vpop.f32.mrf.mxu2 }
 0x235   :  { %vm863_vm8 = vcmp.gt.f32.partialorder %v802_v6, %v2109_v40  ;;  %v1124_v6 = vld [vmem:[%s2636_s1 + $0x60] sm:$0xff] }
 0x23c   :  { %v804_v7 = vpop.f32.mrf.mxu2 }
 0x23d   :  { %vm864_vm9 = vcmp.gt.f32.partialorder %v804_v7, %v2109_v40 }
 0x23e   :  { %vm1778_vm10 = vmpackc.low %vm864_vm9, %vm863_vm8 }
 0x23f   :  { %1779 = vmatmul.msk.bf16.gmra.mxu3 %vm1778_vm10, %v1846_v28 }
 0x242   :  { %v2162_v8 = vpop.f32.mrf.mxu3 }
 0x243   :  { %v1144_v9 = vsub.f32 %v2162_v8, %v1112_v61 }
 0x244   :  { %v807_v10 = vpop.f32.mrf.mxu2 }
 0x245   :  { %v1176_v11 = vand.u32 2147483647, %v1144_v9  ;;  %vm865_vm11 = vcmp.gt.f32.partialorder %v807_v10, %v2109_v40 }
 0x247   :  { %1208 = vadd.xlane.f32.xlu0 %v1176_v11  ;;  %v1125_v11 = vld [vmem:[%s2636_s1 + $0x68] sm:$0xff] }
 0x24a   :  { %v2168_v13 = vpop.f32.mrf.mxu3 }
 0x24b   :  { %v1145_v14 = vsub.f32 %v2168_v13, %v1113_v12 }
 0x24c   :  { %v809_v15 = vpop.f32.mrf.mxu2 }
 0x24d   :  { %vm866_vm12 = vcmp.gt.f32.partialorder %v809_v15, %v2109_v40  ;;  %v1177_v16 = vand.u32 2147483647, %v1145_v14 }
 0x24e   :  { %vm1780_vm13 = vmpackc.low %vm866_vm12, %vm865_vm11 }
 0x24f   :  { %1210 = vadd.xlane.f32.xlu0 %v1177_v16  ;;  %1781 = vmatmul.msk.bf16.gmra.mxu3 %vm1780_vm13, %v1846_v28 }
 0x252   :  { %v2177_v18 = vpop.f32.mrf.mxu3 }
 0x253   :  { %v1146_v19 = vsub.f32 %v2177_v18, %v1114_v17  ;;  %v1126_v17 = vld [vmem:[%s2636_s1 + $0x70] sm:$0xff] }
 0x254   :  { %v812_v20 = vpop.f32.mrf.mxu2 }
 0x255   :  { %v1178_v21 = vand.u32 2147483647, %v1146_v19  ;;  %vm867_vm14 = vcmp.gt.f32.partialorder %v812_v20, %v2109_v40  ;;  %v1272_v19 = vlaneseq }
 0x257   :  { %1212 = vadd.xlane.f32.xlu1 %v1178_v21 }
 0x25a   :  { %v2183_v23 = vpop.f32.mrf.mxu3 }
 0x25b   :  { %v1147_v24 = vsub.f32 %v2183_v23, %v1115_v22  ;;  %v2270_v22 = vand.u32 127, %v1272_v19 }
 0x25c   :  { %v814_v25 = vpop.f32.mrf.mxu2 }
 0x25d   :  { %vm868_vm15 = vcmp.gt.f32.partialorder %v814_v25, %v2109_v40  ;;  %v1179_v27 = vand.u32 2147483647, %v1147_v24 }
 0x25e   :  { %vm1782_vm0 = vmpackc.low %vm868_vm15, %vm867_vm14 }
 0x25f   :  { %1214 = vadd.xlane.f32.xlu1 %v1179_v27  ;;  %1783 = vmatmul.msk.bf16.gmra.mxu3 %vm1782_vm0, %v1846_v28  ;;  %vm1275_vm0 = vcmp.eq.s32.totalorder %v2270_v22, 3 }
 0x262   :  { %v2192_v30 = vpop.f32.mrf.mxu3 }
 0x263   :  { %v1148_v31 = vsub.f32 %v2192_v30, %v1116_v29 }
 0x264   :  { %v817_v32 = vpop.f32.mrf.mxu2 }
 0x265   :  { %v1180_v33 = vand.u32 2147483647, %v1148_v31  ;;  %vm869_vm1 = vcmp.gt.f32.partialorder %v817_v32, %v2109_v40 }
 0x267   :  { %1216 = vadd.xlane.f32.xlu2 %v1180_v33  ;;  %v1128_v33 = vld [vmem:[%s2636_s1 + $0x80] sm:$0xff] }
 0x26a   :  { %v2198_v35 = vpop.f32.mrf.mxu3 }
 0x26b   :  { %v1149_v36 = vsub.f32 %v2198_v35, %v1117_v34 }
 0x26c   :  { %v819_v37 = vpop.f32.mrf.mxu2 }
 0x26d   :  { %vm870_vm2 = vcmp.gt.f32.partialorder %v819_v37, %v2109_v40  ;;  %v1181_v38 = vand.u32 2147483647, %v1149_v36 }
 0x26e   :  { %vm1784_vm3 = vmpackc.low %vm870_vm2, %vm869_vm1  ;;  %vm1274_vm1 = vcmp.lt.s32.totalorder %v2270_v22, 3 }
 0x26f   :  { %1218 = vadd.xlane.f32.xlu2 %v1181_v38  ;;  %1785 = vmatmul.msk.bf16.gmra.mxu3 %vm1784_vm3, %v1846_v28 }
 0x272   :  { %v2207_v39 = vpop.f32.mrf.mxu3 }
 0x273   :  { %v1150_v41 = vsub.f32 %v2207_v39, %v1118_v26 }
 0x274   :  { %v822_v42 = vpop.f32.mrf.mxu2 }
 0x275   :  { %v1182_v43 = vand.u32 2147483647, %v1150_v41  ;;  %vm871_vm4 = vcmp.gt.f32.partialorder %v822_v42, %v2109_v40  ;;  %v1129_v41 = vld [vmem:[%s2636_s1 + $0x88] sm:$0xff] }
 0x277   :  { %1220 = vadd.xlane.f32.xlu0 %v1182_v43 }
 0x27a   :  { %v2213_v45 = vpop.f32.mrf.mxu3 }
 0x27b   :  { %v1151_v46 = vsub.f32 %v2213_v45, %v1119_v44 }
 0x27c   :  { %v824_v47 = vpop.f32.mrf.mxu2 }
 0x27d   :  { %vm872_vm5 = vcmp.gt.f32.partialorder %v824_v47, %v2109_v40  ;;  %v1183_v48 = vand.u32 2147483647, %v1151_v46 }
 0x27e   :  { %vm1786_vm6 = vmpackc.low %vm872_vm5, %vm871_vm4 }
 0x27f   :  { %1222 = vadd.xlane.f32.xlu1 %v1183_v48  ;;  %1787 = vmatmul.msk.bf16.gmra.mxu3 %vm1786_vm6, %v1846_v28  ;;  %v1130_v48 = vld [vmem:[%s2636_s1 + $0x90] sm:$0xff] }
 0x282   :  { %v2222_v50 = vpop.f32.mrf.mxu3 }
 0x283   :  { %v1152_v51 = vsub.f32 %v2222_v50, %v1120_v49 }
 0x284   :  { %v827_v52 = vpop.f32.mrf.mxu2 }
 0x285   :  { %v1184_v53 = vand.u32 2147483647, %v1152_v51  ;;  %vm873_vm7 = vcmp.gt.f32.partialorder %v827_v52, %v2109_v40 }
 0x287   :  { %1224 = vadd.xlane.f32.xlu2 %v1184_v53 }
 0x28a   :  { %v2228_v55 = vpop.f32.mrf.mxu3 }
 0x28b   :  { %v1153_v56 = vsub.f32 %v2228_v55, %v1121_v54 }
 0x28c   :  { %v829_v57 = vpop.f32.mrf.mxu2 }
 0x28d   :  { %vm874_vm8 = vcmp.gt.f32.partialorder %v829_v57, %v2109_v40  ;;  %v1185_v58 = vand.u32 2147483647, %v1153_v56  ;;  %v1131_v56 = vld [vmem:[%s2636_s1 + $0x98] sm:$0xff] }
 0x28e   :  { %vm1788_vm9 = vmpackc.low %vm874_vm8, %vm873_vm7 }
 0x28f   :  { %1226 = vadd.xlane.f32.xlu0 %v1185_v58  ;;  %1789 = vmatmul.msk.bf16.gmra.mxu3 %vm1788_vm9, %v1846_v28 }
 0x292   :  { %v2237_v60 = vpop.f32.mrf.mxu3 }
 0x293   :  { %v1154_v62 = vsub.f32 %v2237_v60, %v1122_v59 }
 0x294   :  { %v832_v63 = vpop.f32.mrf.mxu2 }
 0x295   :  { %v1186_v0 = vand.u32 2147483647, %v1154_v62  ;;  %vm875_vm10 = vcmp.gt.f32.partialorder %v832_v63, %v2109_v40 }
 0x297   :  { %1228 = vadd.xlane.f32.xlu1 %v1186_v0  ;;  %v1132_v0 = vld [vmem:[%s2636_s1 + $0xa0] sm:$0xff] }
 0x29a   :  { %v2243_v2 = vpop.f32.mrf.mxu3 }
 0x29b   :  { %v1155_v3 = vsub.f32 %v2243_v2, %v1123_v1 }
 0x29c   :  { %v834_v4 = vpop.f32.mrf.mxu2 }
 0x29d   :  { %vm876_vm11 = vcmp.gt.f32.partialorder %v834_v4, %v2109_v40  ;;  %v1187_v5 = vand.u32 2147483647, %v1155_v3 }
 0x29e   :  { %vm1790_vm12 = vmpackc.low %vm876_vm11, %vm875_vm10 }
 0x29f   :  { %1230 = vadd.xlane.f32.xlu2 %v1187_v5  ;;  %1791 = vmatmul.msk.bf16.gmra.mxu3 %vm1790_vm12, %v1846_v28 }
 0x2a2   :  { %v2252_v7 = vpop.f32.mrf.mxu3 }
 0x2a3   :  { %v1156_v61 = vsub.f32 %v2252_v7, %v1124_v6 }
 0x2a4   :  { %v837_v9 = vpop.f32.mrf.mxu2 }
 0x2a5   :  { %v1188_v10 = vand.u32 2147483647, %v1156_v61  ;;  %vm877_vm13 = vcmp.gt.f32.partialorder %v837_v9, %v2109_v40  ;;  %v1133_v61 = vld [vmem:[%s2636_s1 + $0xa8] sm:$0xff] }
 0x2a7   :  { %1232 = vadd.xlane.f32.xlu0 %v1188_v10 }
 0x2aa   :  { %v2258_v12 = vpop.f32.mrf.mxu3 }
 0x2ab   :  { %v1157_v14 = vsub.f32 %v2258_v12, %v1125_v11 }
 0x2ac   :  { %v839_v15 = vpop.f32.mrf.mxu2 }
 0x2ad   :  { %vm878_vm14 = vcmp.gt.f32.partialorder %v839_v15, %v2109_v40  ;;  %v1189_v16 = vand.u32 2147483647, %v1157_v14  ;;  %v1127_v40 = vld [vmem:[%s2636_s1 + $0x78] sm:$0xff] }
 0x2ae   :  { %vm1792_vm15 = vmpackc.low %vm878_vm14, %vm877_vm13 }
 0x2af   :  { %1234 = vadd.xlane.f32.xlu1 %v1189_v16  ;;  %1793 = vmatmul.msk.bf16.gmra.mxu3 %vm1792_vm15, %v1846_v28  ;;  %v1134_v16 = vld [vmem:[%s2636_s1 + $0xb0] sm:$0xff] }
 0x2b2   :  { %v2267_v20 = vpop.f32.mrf.mxu3 }
 0x2b3   :  { %v1158_v21 = vsub.f32 %v2267_v20, %v1126_v17 }
 0x2b5   :  { %v1190_v24 = vand.u32 2147483647, %v1158_v21 }
 0x2b7   :  { %1236 = vadd.xlane.f32.xlu2 %v1190_v24 }
 0x2ba   :  { %v1209_v28 = vpop.xlane.xlu0 %1208  ;;  %v2277_v25 = vpop.f32.mrf.mxu3 }
 0x2bb   :  { %v1276_v27 = vsel %vm1275_vm0, %v1209_v28, 0.0  ;;  %v1159_v29 = vsub.f32 %v2277_v25, %v1127_v40  ;;  %v1135_v28 = vld [vmem:[%s2636_s1 + $0xb8] sm:$0xff] }
 0x2bc   :  { %v1308_v31 = vsel %vm1274_vm1, %v2162_v8, %v1276_v27 }
 0x2bd   :  { %1340 = vst [vmem:[%s2637_s5] sm:$0xff] %v1308_v31  ;;  %v1191_v32 = vand.u32 2147483647, %v1159_v29 }
 0x2bf   :  { %1238 = vadd.xlane.f32.xlu0 %v1191_v32 }
 0x2c2   :  { %v1211_v34 = vpop.xlane.xlu0 %1210  ;;  %v2291_v36 = vpop.f32.mrf.mxu3 }
 0x2c3   :  { %v1277_v37 = vsel %vm1275_vm0, %v1211_v34, 0.0  ;;  %v1160_v38 = vsub.f32 %v2291_v36, %v1128_v33  ;;  %v1136_v34 = vld [vmem:[%s2636_s1 + $0xc0] sm:$0xff] }
 0x2c4   :  { %v1309_v8 = vsel %vm1274_vm1, %v2168_v13, %v1277_v37 }
 0x2c5   :  { %1341 = vst [vmem:[%s2637_s5 + $0x8] sm:$0xff] %v1309_v8  ;;  %v1192_v26 = vand.u32 2147483647, %v1160_v38 }
 0x2c7   :  { %1240 = vadd.xlane.f32.xlu1 %v1192_v26 }
 0x2ca   :  { %v1213_v42 = vpop.xlane.xlu1 %1212  ;;  %v2305_v43 = vpop.f32.mrf.mxu3 }
 0x2cb   :  { %v1278_v44 = vsel %vm1275_vm0, %v1213_v42, 0.0  ;;  %v1161_v46 = vsub.f32 %v2305_v43, %v1129_v41  ;;  %v1137_v42 = vld [vmem:[%s2636_s1 + $0xc8] sm:$0xff] }
 0x2cc   :  { %v1310_v13 = vsel %vm1274_vm1, %v2177_v18, %v1278_v44 }
 0x2cd   :  { %1342 = vst [vmem:[%s2637_s5 + $0x10] sm:$0xff] %v1310_v13  ;;  %v1193_v47 = vand.u32 2147483647, %v1161_v46 }
 0x2cf   :  { %1242 = vadd.xlane.f32.xlu2 %v1193_v47 }
 0x2d2   :  { %v1215_v49 = vpop.xlane.xlu1 %1214  ;;  %v2319_v51 = vpop.f32.mrf.mxu3 }
 0x2d3   :  { %v1279_v52 = vsel %vm1275_vm0, %v1215_v49, 0.0  ;;  %v1162_v53 = vsub.f32 %v2319_v51, %v1130_v48  ;;  %v1138_v49 = vld [vmem:[%s2636_s1 + $0xd0] sm:$0xff] }
 0x2d4   :  { %v1311_v18 = vsel %vm1274_vm1, %v2183_v23, %v1279_v52 }
 0x2d5   :  { %1343 = vst [vmem:[%s2637_s5 + $0x18] sm:$0xff] %v1311_v18  ;;  %v1194_v54 = vand.u32 2147483647, %v1162_v53 }
 0x2d7   :  { %1244 = vadd.xlane.f32.xlu0 %v1194_v54 }
 0x2da   :  { %v1217_v57 = vpop.xlane.xlu2 %1216  ;;  %v2333_v58 = vpop.f32.mrf.mxu3 }
 0x2db   :  { %v1280_v59 = vsel %vm1275_vm0, %v1217_v57, 0.0  ;;  %v1163_v62 = vsub.f32 %v2333_v58, %v1131_v56  ;;  %v1139_v57 = vld [vmem:[%s2636_s1 + $0xd8] sm:$0xff] }
 0x2dc   :  { %v1312_v23 = vsel %vm1274_vm1, %v2192_v30, %v1280_v59 }
 0x2dd   :  { %1344 = vst [vmem:[%s2637_s5 + $0x20] sm:$0xff] %v1312_v23  ;;  %v1195_v63 = vand.u32 2147483647, %v1163_v62 }
 0x2df   :  { %1246 = vadd.xlane.f32.xlu1 %v1195_v63 }
 0x2e2   :  { %v1219_v1 = vpop.xlane.xlu2 %1218  ;;  %v2347_v3 = vpop.f32.mrf.mxu3 }
 0x2e3   :  { %v1281_v4 = vsel %vm1275_vm0, %v1219_v1, 0.0  ;;  %v1164_v5 = vsub.f32 %v2347_v3, %v1132_v0  ;;  %v1140_v1 = vld [vmem:[%s2636_s1 + $0xe0] sm:$0xff] }
 0x2e4   :  { %v1313_v30 = vsel %vm1274_vm1, %v2198_v35, %v1281_v4 }
 0x2e5   :  { %1345 = vst [vmem:[%s2637_s5 + $0x28] sm:$0xff] %v1313_v30  ;;  %v1196_v6 = vand.u32 2147483647, %v1164_v5 }
 0x2e7   :  { %1248 = vadd.xlane.f32.xlu2 %v1196_v6 }
 0x2ea   :  { %v1221_v9 = vpop.xlane.xlu0 %1220  ;;  %v2361_v10 = vpop.f32.mrf.mxu3 }
 0x2eb   :  { %v1282_v11 = vsel %vm1275_vm0, %v1221_v9, 0.0  ;;  %v1165_v14 = vsub.f32 %v2361_v10, %v1133_v61  ;;  %v1141_v9 = vld [vmem:[%s2636_s1 + $0xe8] sm:$0xff] }
 0x2ec   :  { %v1314_v35 = vsel %vm1274_vm1, %v2207_v39, %v1282_v11 }
 0x2ed   :  { %1346 = vst [vmem:[%s2637_s5 + $0x30] sm:$0xff] %v1314_v35  ;;  %v1197_v15 = vand.u32 2147483647, %v1165_v14 }
 0x2ef   :  { %1250 = vadd.xlane.f32.xlu0 %v1197_v15 }
 0x2f2   :  { %v1223_v17 = vpop.xlane.xlu1 %1222  ;;  %v2375_v19 = vpop.f32.mrf.mxu3 }
 0x2f3   :  { %v1283_v21 = vsel %vm1275_vm0, %v1223_v17, 0.0  ;;  %v1166_v24 = vsub.f32 %v2375_v19, %v1134_v16  ;;  %v1142_v17 = vld [vmem:[%s2636_s1 + $0xf0] sm:$0xff] }
 0x2f4   :  { %v1315_v39 = vsel %vm1274_vm1, %v2213_v45, %v1283_v21 }
 0x2f5   :  { %1347 = vst [vmem:[%s2637_s5 + $0x38] sm:$0xff] %v1315_v39  ;;  %v1198_v40 = vand.u32 2147483647, %v1166_v24 }
 0x2f7   :  { %1252 = vadd.xlane.f32.xlu1 %v1198_v40 }
 0x2fa   :  { %v1225_v27 = vpop.xlane.xlu2 %1224  ;;  %v2389_v29 = vpop.f32.mrf.mxu3 }
 0x2fb   :  { %v1284_v31 = vsel %vm1275_vm0, %v1225_v27, 0.0  ;;  %v1167_v32 = vsub.f32 %v2389_v29, %v1135_v28  ;;  %v1143_v27 = vld [vmem:[%s2636_s1 + $0xf8] sm:$0xff] }
 0x2fc   :  { %v1316_v45 = vsel %vm1274_vm1, %v2222_v50, %v1284_v31 }
 0x2fd   :  { %1348 = vst [vmem:[%s2637_s5 + $0x40] sm:$0xff] %v1316_v45  ;;  %v1199_v33 = vand.u32 2147483647, %v1167_v32 }
 0x2ff   :  { %1254 = vadd.xlane.f32.xlu2 %v1199_v33 }
 0x302   :  { %v1227_v37 = vpop.xlane.xlu0 %1226  ;;  %v2403_v38 = vpop.f32.mrf.mxu3 }
 0x303   :  { %v1285_v8 = vsel %vm1275_vm0, %v1227_v37, 0.0  ;;  %v1168_v26 = vsub.f32 %v2403_v38, %v1136_v34 }
 0x304   :  { %v1317_v50 = vsel %vm1274_vm1, %v2228_v55, %v1285_v8 }
 0x305   :  { %1349 = vst [vmem:[%s2637_s5 + $0x48] sm:$0xff] %v1317_v50  ;;  %v1200_v41 = vand.u32 2147483647, %v1168_v26 }
 0x307   :  { %1256 = vadd.xlane.f32.xlu0 %v1200_v41 }
 0x30a   :  { %v1229_v44 = vpop.xlane.xlu1 %1228  ;;  %v2417_v46 = vpop.f32.mrf.mxu3 }
 0x30b   :  { %v1286_v13 = vsel %vm1275_vm0, %v1229_v44, 0.0  ;;  %v1169_v47 = vsub.f32 %v2417_v46, %v1137_v42 }
 0x30c   :  { %v1318_v55 = vsel %vm1274_vm1, %v2237_v60, %v1286_v13 }
 0x30d   :  { %1350 = vst [vmem:[%s2637_s5 + $0x50] sm:$0xff] %v1318_v55  ;;  %v1201_v48 = vand.u32 2147483647, %v1169_v47 }
 0x30f   :  { %1258 = vadd.xlane.f32.xlu1 %v1201_v48 }
 0x312   :  { %v1231_v52 = vpop.xlane.xlu2 %1230  ;;  %v2431_v53 = vpop.f32.mrf.mxu3 }
 0x313   :  { %v1287_v18 = vsel %vm1275_vm0, %v1231_v52, 0.0  ;;  %v1170_v54 = vsub.f32 %v2431_v53, %v1138_v49 }
 0x314   :  { %v1319_v60 = vsel %vm1274_vm1, %v2243_v2, %v1287_v18 }
 0x315   :  { %1351 = vst [vmem:[%s2637_s5 + $0x58] sm:$0xff] %v1319_v60  ;;  %v1202_v56 = vand.u32 2147483647, %v1170_v54 }
 0x317   :  { %1260 = vadd.xlane.f32.xlu2 %v1202_v56 }
 0x31a   :  { %v1233_v59 = vpop.xlane.xlu0 %1232  ;;  %v2445_v62 = vpop.f32.mrf.mxu3 }
 0x31b   :  { %v1288_v23 = vsel %vm1275_vm0, %v1233_v59, 0.0  ;;  %v1171_v63 = vsub.f32 %v2445_v62, %v1139_v57 }
 0x31c   :  { %v1320_v2 = vsel %vm1274_vm1, %v2252_v7, %v1288_v23 }
 0x31d   :  { %1352 = vst [vmem:[%s2637_s5 + $0x60] sm:$0xff] %v1320_v2  ;;  %v1203_v0 = vand.u32 2147483647, %v1171_v63 }
 0x31f   :  { %1262 = vadd.xlane.f32.xlu0 %v1203_v0 }
 0x322   :  { %v1235_v4 = vpop.xlane.xlu1 %1234  ;;  %v2459_v5 = vpop.f32.mrf.mxu3 }
 0x323   :  { %v1289_v30 = vsel %vm1275_vm0, %v1235_v4, 0.0  ;;  %v1172_v6 = vsub.f32 %v2459_v5, %v1140_v1 }
 0x324   :  { %v1321_v7 = vsel %vm1274_vm1, %v2258_v12, %v1289_v30 }
 0x325   :  { %1353 = vst [vmem:[%s2637_s5 + $0x68] sm:$0xff] %v1321_v7  ;;  %v1204_v61 = vand.u32 2147483647, %v1172_v6 }
 0x327   :  { %1264 = vadd.xlane.f32.xlu1 %v1204_v61 }
 0x32a   :  { %v1237_v11 = vpop.xlane.xlu2 %1236  ;;  %v2473_v14 = vpop.f32.mrf.mxu3 }
 0x32b   :  { %v1290_v35 = vsel %vm1275_vm0, %v1237_v11, 0.0  ;;  %v1173_v15 = vsub.f32 %v2473_v14, %v1141_v9 }
 0x32c   :  { %v1322_v12 = vsel %vm1274_vm1, %v2267_v20, %v1290_v35 }
 0x32d   :  { %1354 = vst [vmem:[%s2637_s5 + $0x70] sm:$0xff] %v1322_v12  ;;  %v1205_v16 = vand.u32 2147483647, %v1173_v15 }
 0x32f   :  { %1266 = vadd.xlane.f32.xlu2 %v1205_v16 }
 0x332   :  { %v1239_v21 = vpop.xlane.xlu0 %1238  ;;  %v2487_v24 = vpop.f32.mrf.mxu3 }
 0x333   :  { %v1291_v39 = vsel %vm1275_vm0, %v1239_v21, 0.0  ;;  %v1174_v40 = vsub.f32 %v2487_v24, %v1142_v17 }
 0x334   :  { %v1323_v20 = vsel %vm1274_vm1, %v2277_v25, %v1291_v39 }
 0x335   :  { %1355 = vst [vmem:[%s2637_s5 + $0x78] sm:$0xff] %v1323_v20  ;;  %v1206_v28 = vand.u32 2147483647, %v1174_v40 }
 0x337   :  { %1268 = vadd.xlane.f32.xlu0 %v1206_v28 }
 0x33a   :  { %v1241_v31 = vpop.xlane.xlu1 %1240  ;;  %v2501_v32 = vpop.f32.mrf.mxu3 }
 0x33b   :  { %v1292_v45 = vsel %vm1275_vm0, %v1241_v31, 0.0  ;;  %v1175_v33 = vsub.f32 %v2501_v32, %v1143_v27 }
 0x33c   :  { %v1324_v25 = vsel %vm1274_vm1, %v2291_v36, %v1292_v45 }
 0x33d   :  { %1356 = vst [vmem:[%s2637_s5 + $0x80] sm:$0xff] %v1324_v25  ;;  %v1207_v34 = vand.u32 2147483647, %v1175_v33 }
 0x33f   :  { %1270 = vadd.xlane.f32.xlu1 %v1207_v34 }
 0x342   :  { %v1243_v37 = vpop.xlane.xlu2 %1242 }
 0x343   :  { %v1293_v8 = vsel %vm1275_vm0, %v1243_v37, 0.0 }
 0x344   :  { %v1325_v26 = vsel %vm1274_vm1, %v2305_v43, %v1293_v8 }
 0x345   :  { %1357 = vst [vmem:[%s2637_s5 + $0x88] sm:$0xff] %v1325_v26 }
 0x34a   :  { %v1245_v50 = vpop.xlane.xlu0 %1244 }
 0x34b   :  { %v1294_v36 = vsel %vm1275_vm0, %v1245_v50, 0.0 }
 0x34c   :  { %v1326_v41 = vsel %vm1274_vm1, %v2319_v51, %v1294_v36 }
 0x34d   :  { %1358 = vst [vmem:[%s2637_s5 + $0x90] sm:$0xff] %v1326_v41 }
 0x352   :  { %v1247_v42 = vpop.xlane.xlu1 %1246 }
 0x353   :  { %v1295_v43 = vsel %vm1275_vm0, %v1247_v42, 0.0 }
 0x354   :  { %v1327_v44 = vsel %vm1274_vm1, %v2333_v58, %v1295_v43 }
 0x355   :  { %1359 = vst [vmem:[%s2637_s5 + $0x98] sm:$0xff] %v1327_v44 }
 0x35a   :  { %v1249_v13 = vpop.xlane.xlu2 %1248 }
 0x35b   :  { %v1296_v51 = vsel %vm1275_vm0, %v1249_v13, 0.0 }
 0x35c   :  { %v1328_v47 = vsel %vm1274_vm1, %v2347_v3, %v1296_v51 }
 0x35d   :  { %1360 = vst [vmem:[%s2637_s5 + $0xa0] sm:$0xff] %v1328_v47 }
 0x362   :  { %v1251_v55 = vpop.xlane.xlu0 %1250 }
 0x363   :  { %v1297_v58 = vsel %vm1275_vm0, %v1251_v55, 0.0 }
 0x364   :  { %v1329_v48 = vsel %vm1274_vm1, %v2361_v10, %v1297_v58 }
 0x365   :  { %1361 = vst [vmem:[%s2637_s5 + $0xa8] sm:$0xff] %v1329_v48 }
 0x36a   :  { %v1253_v49 = vpop.xlane.xlu1 %1252 }
 0x36b   :  { %v1298_v3 = vsel %vm1275_vm0, %v1253_v49, 0.0 }
 0x36c   :  { %v1330_v52 = vsel %vm1274_vm1, %v2375_v19, %v1298_v3 }
 0x36d   :  { %1362 = vst [vmem:[%s2637_s5 + $0xb0] sm:$0xff] %v1330_v52 }
 0x372   :  { %v1255_v18 = vpop.xlane.xlu2 %1254 }
 0x373   :  { %v1299_v10 = vsel %vm1275_vm0, %v1255_v18, 0.0 }
 0x374   :  { %v1331_v54 = vsel %vm1274_vm1, %v2389_v29, %v1299_v10 }
 0x375   :  { %1363 = vst [vmem:[%s2637_s5 + $0xb8] sm:$0xff] %v1331_v54 }
 0x37a   :  { %v1257_v60 = vpop.xlane.xlu0 %1256 }
 0x37b   :  { %v1300_v19 = vsel %vm1275_vm0, %v1257_v60, 0.0 }
 0x37c   :  { %v1332_v56 = vsel %vm1274_vm1, %v2403_v38, %v1300_v19 }
 0x37d   :  { %1364 = vst [vmem:[%s2637_s5 + $0xc0] sm:$0xff] %v1332_v56 }
 0x382   :  { %v1259_v57 = vpop.xlane.xlu1 %1258 }
 0x383   :  { %v1301_v29 = vsel %vm1275_vm0, %v1259_v57, 0.0 }
 0x384   :  { %v1333_v59 = vsel %vm1274_vm1, %v2417_v46, %v1301_v29 }
 0x385   :  { %1365 = vst [vmem:[%s2637_s5 + $0xc8] sm:$0xff] %v1333_v59 }
 0x38a   :  { %v1261_v23 = vpop.xlane.xlu2 %1260 }
 0x38b   :  { %v1302_v38 = vsel %vm1275_vm0, %v1261_v23, 0.0 }
 0x38c   :  { %v1334_v63 = vsel %vm1274_vm1, %v2431_v53, %v1302_v38 }
 0x38d   :  { %1366 = vst [vmem:[%s2637_s5 + $0xd0] sm:$0xff] %v1334_v63 }
 0x392   :  { %v1263_v2 = vpop.xlane.xlu0 %1262 }
 0x393   :  { %v1303_v46 = vsel %vm1275_vm0, %v1263_v2, 0.0 }
 0x394   :  { %v1335_v0 = vsel %vm1274_vm1, %v2445_v62, %v1303_v46 }
 0x395   :  { %1367 = vst [vmem:[%s2637_s5 + $0xd8] sm:$0xff] %v1335_v0 }
 0x39a   :  { %v1265_v1 = vpop.xlane.xlu1 %1264 }
 0x39b   :  { %v1304_v53 = vsel %vm1275_vm0, %v1265_v1, 0.0 }
 0x39c   :  { %v1336_v4 = vsel %vm1274_vm1, %v2459_v5, %v1304_v53 }
 0x39d   :  { %1368 = vst [vmem:[%s2637_s5 + $0xe0] sm:$0xff] %v1336_v4 }
 0x3a2   :  { %v1267_v30 = vpop.xlane.xlu2 %1266 }
 0x3a3   :  { %v1305_v62 = vsel %vm1275_vm0, %v1267_v30, 0.0 }
 0x3a4   :  { %v1337_v6 = vsel %vm1274_vm1, %v2473_v14, %v1305_v62 }
 0x3a5   :  { %1369 = vst [vmem:[%s2637_s5 + $0xe8] sm:$0xff] %v1337_v6 }
 0x3aa   :  { %v1269_v7 = vpop.xlane.xlu0 %1268 }
 0x3ab   :  { %v1306_v5 = vsel %vm1275_vm0, %v1269_v7, 0.0 }
 0x3ac   :  { %v1338_v61 = vsel %vm1274_vm1, %v2487_v24, %v1306_v5 }
 0x3ad   :  { %1370 = vst [vmem:[%s2637_s5 + $0xf0] sm:$0xff] %v1338_v61 }
 0x3b2   :  { %v1271_v9 = vpop.xlane.xlu1 %1270 }
 0x3b3   :  { %v1307_v11 = vsel %vm1275_vm0, %v1271_v9, 0.0 }
 0x3b4   :  { %v1339_v14 = vsel %vm1274_vm1, %v2501_v32, %v1307_v11 }
 0x3b5   :  { %1371 = vst [vmem:[%s2637_s5 + $0xf8] sm:$0xff] %v1339_v14 }

</bundles_post_ra>
